<compile_context>
chip_gen: v5e
topology: v5e:2x2
jax: 0.10.0
libtpu: 0.0.40
codegen_flags: <defaults>
</compile_context>

<pallas_src>
import functools

import jax
import jax.numpy as jnp
from jax.experimental import pallas as pl
from jax.experimental.pallas import tpu as pltpu

EPS = 1e-6


def _round_up(x, m):
    return ((x + m - 1) // m) * m


def _vmem_capacity_bytes():
    # Per-TensorCore VMEM; fall back to the v7x floor (64 MiB) if the query fails.
    try:
        return int(pltpu.get_tpu_info().vmem_capacity_bytes)
    except Exception:
        return 64 * 1024 * 1024


def _bspec(shape, index_map, buffers=2):
    """BlockSpec helper: request single-buffering for constant-index operands."""
    if buffers == 2:
        return pl.BlockSpec(shape, index_map)
    try:
        return pl.BlockSpec(shape, index_map, pipeline_mode=pl.Buffered(buffers))
    except TypeError:  # older jax without pipeline_mode: fall back to default buffering
        return pl.BlockSpec(shape, index_map)


def _divisor_tks(Dp, tk_cap):
    """Ascending list of K-tile sizes (multiples of 128 that divide Dp, <= tk_cap)."""
    n = Dp // 128
    tks = sorted(128 * d for d in range(1, n + 1) if n % d == 0 and 128 * d <= tk_cap)
    return tks or [128]


def _select_tiles(M, Dp, x_itemsize, out_itemsize, tile_rows, tk_cap, budget):
    """Pick (tm, tk) under a VMEM budget; keep >=2 row tiles when M allows."""
    tks = list(_divisor_tks(Dp, tk_cap))
    tk = tks[-1]

    tm = _round_up(max(tile_rows, 128), 128)
    half = -(-M // 2)          # cap so the 'parallel' row axis gets >= 2 steps (dual-TC v7x)
    if half < tm:
        tm = _round_up(half, 8) if half < 128 else _round_up(half, 128)
    tm = max(tm, 8)

    def vmem(tm_, tk_):
        w_bufs = 1 if tk_ == Dp else 2          # weight is single-buffered when K axis is trivial
        return (2 * tm_ * tk_ * x_itemsize      # x tile, double-buffered
                + w_bufs * tk_ * Dp * 2         # bf16 weight tile
                + 2 * tm_ * Dp * out_itemsize   # out tile, double-buffered
                + tm_ * Dp * 4                  # f32 accumulator scratch
                + 8 * Dp * 4)                   # bias / a_2 / b_2 / mask vectors

    while vmem(tm, tk) > budget and tm > 128:
        tm = max(128, _round_up(tm // 2, 128))
    while vmem(tm, tk) > budget and len(tks) > 1:
        tks.pop()
        tk = tks[-1]
    # TODO(synk): if still over budget here (enormous Dp), add an output-N split too.
    return tm, tk


def _sublayer_connection_kernel(x_ref, w_ref, wb_ref, a_ref, b_ref, mask_ref,
                                o_ref, acc_ref, *, d_actual, use_mask, tk):
    # x_ref: (tm, tk) model dtype | w_ref: (tk, Dp) bf16 | wb/a/b/mask: (1, Dp) f32
    # o_ref: (tm, Dp) model dtype | acc_ref: (tm, Dp) f32 scratch
    k = pl.program_id(1)
    nk = pl.num_programs(1)

    @pl.when(k == 0)
    def _():
        acc_ref[...] = jnp.zeros_like(acc_ref)

    x = x_ref[...]

    # sublayer(x): fused Linear chunk -- bf16 MXU matmul, f32 accumulation.
    acc_ref[...] += jnp.dot(x.astype(jnp.bfloat16), w_ref[...],
                            preferred_element_type=jnp.float32)

    # Residual: add this x K-chunk (exact f32) into its lane slice of the accumulator.
    col0 = pl.multiple_of(k * tk, 128)
    acc_ref[:, pl.ds(col0, tk)] += x.astype(jnp.float32)

    # dropout(sublayer(x)): eval mode -> identity.
    # TODO(synk): training-mode dropout (pltpu.prng_* mask on the matmul term) not emitted.

    @pl.when(k == nk - 1)
    def _():
        z = acc_ref[...] + wb_ref[...]                       # x + Linear(x), f32
        mean = jnp.sum(z, axis=-1, keepdims=True) * (1.0 / d_actual)
        diff = z - mean
        dm = diff * mask_ref[...] if use_mask else diff      # mask padded lanes out of var
        var = jnp.sum(dm * dm, axis=-1, keepdims=True) * (1.0 / (d_actual - 1))
        std = jnp.sqrt(var)                                  # torch std: unbiased, eps on std
        inv = pl.reciprocal(std + EPS, approx=False)
        o_ref[...] = (a_ref[...] * diff * inv + b_ref[...]).astype(o_ref.dtype)


def pack_params(w_lin, b_lin, a2, b2):
    """One-time packing of parameters: bf16 weight + lane-padding to a multiple of 128."""
    D = w_lin.shape[0]
    Dp = _round_up(D, 128)
    pad = Dp - D
    wp = jnp.pad(w_lin.astype(jnp.bfloat16), ((0, pad), (0, pad)))
    wb = jnp.pad(b_lin.astype(jnp.float32), (0, pad)).reshape(1, Dp)
    a2p = jnp.pad(a2.astype(jnp.float32), (0, pad)).reshape(1, Dp)
    b2p = jnp.pad(b2.astype(jnp.float32), (0, pad)).reshape(1, Dp)
    mask = (jnp.arange(Dp) < D).astype(jnp.float32).reshape(1, Dp)
    return wp, wb, a2p, b2p, mask


def sublayer_connection(x, packed, *, tile_rows=512, tk_cap=1024):
    """LayerNorm(x + Linear(x)) with torch-std semantics. x: (B, S, D), model dtype I/O."""
    wp, wb, a2p, b2p, mask = packed
    B, S, D = x.shape
    assert D >= 2, "unbiased std (N-1) is degenerate for D < 2"
    M = B * S
    orig_dtype = x.dtype
    Dp = wp.shape[1]

    x2 = x.reshape(M, D)
    if Dp != D:                       # pad D only when it is not already lane-aligned
        x2 = jnp.pad(x2, ((0, 0), (0, Dp - D)))

    itemsize = jnp.dtype(orig_dtype).itemsize
    vmem_cap = _vmem_capacity_bytes()
    vmem_limit = min(int(vmem_cap * 0.9), 112 * 1024 * 1024)
    tm, tk = _select_tiles(M, Dp, itemsize, itemsize, tile_rows, tk_cap,
                           budget=int(vmem_limit * 0.75))
    grid = (pl.cdiv(M, tm), Dp // tk)
    nk = grid[1]

    kernel = functools.partial(_sublayer_connection_kernel,
                               d_actual=D, use_mask=(Dp != D), tk=tk)

    cost = pl.CostEstimate(
        flops=2 * M * Dp * Dp + 12 * M * Dp,
        transcendentals=2 * M,
        bytes_accessed=(2 * M * Dp * itemsize          # x read + out write (model dtype)
                        + grid[0] * Dp * Dp * 2        # bf16 weight, re-read per row tile
                        + 4 * Dp * 4),
    )

    out = pl.pallas_call(
        kernel,
        out_shape=jax.ShapeDtypeStruct((M, Dp), orig_dtype),
        grid=grid,
        in_specs=[
            _bspec((tm, tk), lambda i, k: (i, k)),                         # x row/K tile
            _bspec((tk, Dp), lambda i, k: (k, 0),
                   buffers=1 if nk == 1 else 2),                           # bf16 weight
            _bspec((1, Dp), lambda i, k: (0, 0), buffers=1),               # Linear bias
            _bspec((1, Dp), lambda i, k: (0, 0), buffers=1),               # LayerNorm a_2
            _bspec((1, Dp), lambda i, k: (0, 0), buffers=1),               # LayerNorm b_2
            _bspec((1, Dp), lambda i, k: (0, 0), buffers=1),               # lane mask
        ],
        out_specs=pl.BlockSpec((tm, Dp), lambda i, k: (i, 0)),
        scratch_shapes=[pltpu.VMEM((tm, Dp), jnp.float32)],
        compiler_params=pltpu.CompilerParams(
            dimension_semantics=("parallel", "arbitrary"),
            vmem_limit_bytes=vmem_limit,
        ),
        cost_estimate=cost,
    )(x2, wp, wb, a2p, b2p, mask)

    if Dp != D:
        out = out[:, :D]
    return out.reshape(B, S, D)


def _reference(x, w_lin, b_lin, a2, b2):
    s = jnp.einsum("bsd,de->bse", x, w_lin) + b_lin
    z = x + s
    mean = z.mean(-1, keepdims=True)
    std = jnp.sqrt(((z - mean) ** 2).sum(-1, keepdims=True) / (z.shape[-1] - 1))
    return a2 * (z - mean) / (std + EPS) + b2


if __name__ == "__main__":
    B, S, D = 2, 8, 32  # batch, seq, hidden (features = last axis)

    key = jax.random.PRNGKey(0)
    kx, kw, kb = jax.random.split(key, 3)

    x = jax.random.normal(kx, (B, S, D), dtype=jnp.float32)

    # Deterministic parameter init (shapes from module __init__):
    #   LayerNorm(size): a_2 = ones(D), b_2 = zeros(D);  sublayer := Linear(D, D)
    a2 = jnp.ones((D,), jnp.float32)
    b2 = jnp.zeros((D,), jnp.float32)
    w_lin = jax.random.normal(kw, (D, D), dtype=jnp.float32) * 0.05
    b_lin = jax.random.normal(kb, (D,), dtype=jnp.float32) * 0.05

    packed = pack_params(w_lin, b_lin, a2, b2)   # one-time bf16 cast + pad (not per-call)
    out = sublayer_connection(x, packed)
    out = jax.block_until_ready(out)

    ref = _reference(x, w_lin, b_lin, a2, b2)
    assert out.shape == (B, S, D)
    # Tolerance accounts for the bf16 MXU matmul (deliberate divergence from PyTorch's
    # f32 Linear); residual add and LayerNorm math are exact f32.
    assert jnp.allclose(out, ref, atol=2e-2, rtol=2e-2), "mismatch vs reference"

    print("KERNEL_OK")
</pallas_src>

<mosaic_0001>
module attributes {stable_mosaic.version = 11 : i64} {
  func.func @_sublayer_connection_kernel(%arg0: i32, %arg1: i32, %arg2: memref<8x128xf32, #tpu.memory_space<vmem>>, %arg3: memref<128x128xbf16, #tpu.memory_space<vmem>>, %arg4: memref<1x128xf32, #tpu.memory_space<vmem>>, %arg5: memref<1x128xf32, #tpu.memory_space<vmem>>, %arg6: memref<1x128xf32, #tpu.memory_space<vmem>>, %arg7: memref<1x128xf32, #tpu.memory_space<vmem>>, %arg8: memref<8x128xf32, #tpu.memory_space<vmem>>, %arg9: memref<8x128xf32, #tpu.memory_space<vmem>>) attributes {dimension_semantics = [#tpu.dimension_semantics<parallel>, #tpu.dimension_semantics<arbitrary>], iteration_bounds = array<i64: 2, 1>, scalar_prefetch = 0 : i64, scratch_operands = 1 : i64, tpu.core_type = #tpu.core_type<tc>, window_params = [{transform_indices = @transform_0, window_bounds = array<i64: 8, 128>}, {pipeline_mode = #tpu.pipeline_mode<synchronous>, transform_indices = @transform_1, window_bounds = array<i64: 128, 128>}, {pipeline_mode = #tpu.pipeline_mode<synchronous>, transform_indices = @transform_2, window_bounds = array<i64: 1, 128>}, {pipeline_mode = #tpu.pipeline_mode<synchronous>, transform_indices = @transform_3, window_bounds = array<i64: 1, 128>}, {pipeline_mode = #tpu.pipeline_mode<synchronous>, transform_indices = @transform_4, window_bounds = array<i64: 1, 128>}, {pipeline_mode = #tpu.pipeline_mode<synchronous>, transform_indices = @transform_5, window_bounds = array<i64: 1, 128>}, {transform_indices = @transform_6, window_bounds = array<i64: 8, 128>}]} {
    %c0_i32 = arith.constant 0 : i32
    %0 = arith.cmpi eq, %arg1, %c0_i32 : i32
    %1 = arith.extui %0 : i1 to i32
    %c0_i32_0 = arith.constant 0 : i32
    %2 = arith.cmpi ne, %1, %c0_i32_0 : i32
    scf.if %2 {
      %cst_12 = arith.constant 0.000000e+00 : f32
      %20 = vector.broadcast %cst_12 : f32 to vector<8x128xf32>
      %c0_13 = arith.constant 0 : index
      %c0_14 = arith.constant 0 : index
      %21 = vector.load %arg9[%c0_13, %c0_14] : memref<8x128xf32, #tpu.memory_space<vmem>>, vector<8x128xf32>
      tpu.vector_store %arg9[%c0_13, %c0_14], %20 {strides = array<i32>} : memref<8x128xf32, #tpu.memory_space<vmem>>, vector<8x128xf32>,
    } else {
    }
    %c0 = arith.constant 0 : index
    %c0_1 = arith.constant 0 : index
    %3 = vector.load %arg2[%c0, %c0_1] : memref<8x128xf32, #tpu.memory_space<vmem>>, vector<8x128xf32>
    %c0_2 = arith.constant 0 : index
    %c0_3 = arith.constant 0 : index
    %4 = vector.load %arg9[%c0_2, %c0_3] : memref<8x128xf32, #tpu.memory_space<vmem>>, vector<8x128xf32>
    %5 = arith.truncf %3 : vector<8x128xf32> to vector<8x128xbf16>
    %c0_4 = arith.constant 0 : index
    %c0_5 = arith.constant 0 : index
    %6 = vector.load %arg3[%c0_4, %c0_5] : memref<128x128xbf16, #tpu.memory_space<vmem>>, vector<128x128xbf16>
    %cst = arith.constant dense<0.000000e+00> : vector<8x128xf32>
    %7 = tpu.matmul %5, %6, %cst {dimension_numbers = #tpu.dot_dimension_numbers<[1], [0], [0], [1], [0, 0, 1, 1], [], []>} : vector<8x128xbf16>, vector<128x128xbf16>, vector<8x128xf32> -> vector<8x128xf32>
    %8 = arith.addf %4, %7 : vector<8x128xf32>
    %c0_6 = arith.constant 0 : index
    %c0_7 = arith.constant 0 : index
    %9 = vector.load %arg9[%c0_6, %c0_7] : memref<8x128xf32, #tpu.memory_space<vmem>>, vector<8x128xf32>
    tpu.vector_store %arg9[%c0_6, %c0_7], %8 {strides = array<i32>} : memref<8x128xf32, #tpu.memory_space<vmem>>, vector<8x128xf32>,
    %c128_i32 = arith.constant 128 : i32
    %10 = arith.muli %arg1, %c128_i32 : i32
    %11 = tpu.assume_multiple %10, 128 : i32
    %c0_8 = arith.constant 0 : index
    %12 = arith.index_cast %11 : i32 to index
    %13 = vector.load %arg9[%c0_8, %12] : memref<8x128xf32, #tpu.memory_space<vmem>>, vector<8x128xf32>
    %14 = arith.addf %13, %3 : vector<8x128xf32>
    %c0_9 = arith.constant 0 : index
    %15 = arith.index_cast %11 : i32 to index
    %16 = vector.load %arg9[%c0_9, %15] : memref<8x128xf32, #tpu.memory_space<vmem>>, vector<8x128xf32>
    tpu.vector_store %arg9[%c0_9, %15], %14 {strides = array<i32>} : memref<8x128xf32, #tpu.memory_space<vmem>>, vector<8x128xf32>,
    %c0_i32_10 = arith.constant 0 : i32
    %17 = arith.cmpi eq, %arg1, %c0_i32_10 : i32
    %18 = arith.extui %17 : i1 to i32
    %c0_i32_11 = arith.constant 0 : i32
    %19 = arith.cmpi ne, %18, %c0_i32_11 : i32
    scf.if %19 {
      %c0_12 = arith.constant 0 : index
      %c0_13 = arith.constant 0 : index
      %20 = vector.load %arg9[%c0_12, %c0_13] : memref<8x128xf32, #tpu.memory_space<vmem>>, vector<8x128xf32>
      %c0_14 = arith.constant 0 : index
      %c0_15 = arith.constant 0 : index
      %21 = vector.load %arg4[%c0_14, %c0_15] : memref<1x128xf32, #tpu.memory_space<vmem>>, vector<1x128xf32>
      %22 = vector.broadcast %21 : vector<1x128xf32> to vector<8x128xf32>
      %23 = arith.addf %20, %22 : vector<8x128xf32>
      %cst_16 = arith.constant dense<0.000000e+00> : vector<8xf32>
      %24 = vector.multi_reduction <add>, %23, %cst_16 [1] : vector<8x128xf32> to vector<8xf32>
      %25 = vector.shape_cast %24 : vector<8xf32> to vector<8x1xf32>
      %cst_17 = arith.constant 3.125000e-02 : f32
      %26 = vector.broadcast %cst_17 : f32 to vector<8x1xf32>
      %27 = arith.mulf %25, %26 : vector<8x1xf32>
      %28 = vector.broadcast %27 : vector<8x1xf32> to vector<8x128xf32>
      %29 = arith.subf %23, %28 : vector<8x128xf32>
      %c0_18 = arith.constant 0 : index
      %c0_19 = arith.constant 0 : index
      %30 = vector.load %arg7[%c0_18, %c0_19] : memref<1x128xf32, #tpu.memory_space<vmem>>, vector<1x128xf32>
      %31 = vector.broadcast %30 : vector<1x128xf32> to vector<8x128xf32>
      %32 = arith.mulf %29, %31 : vector<8x128xf32>
      %33 = arith.mulf %32, %32 : vector<8x128xf32>
      %cst_20 = arith.constant dense<0.000000e+00> : vector<8xf32>
      %34 = vector.multi_reduction <add>, %33, %cst_20 [1] : vector<8x128xf32> to vector<8xf32>
      %35 = vector.shape_cast %34 : vector<8xf32> to vector<8x1xf32>
      %cst_21 = arith.constant 0.0322580636 : f32
      %36 = vector.broadcast %cst_21 : f32 to vector<8x1xf32>
      %37 = arith.mulf %35, %36 : vector<8x1xf32>
      %38 = math.sqrt %37 : vector<8x1xf32>
      %cst_22 = arith.constant 9.99999997E-7 : f32
      %39 = vector.broadcast %cst_22 : f32 to vector<8x1xf32>
      %40 = arith.addf %38, %39 : vector<8x1xf32>
      %41 = tpu.reciprocal %40 : vector<8x1xf32> -> vector<8x1xf32>
      %c0_23 = arith.constant 0 : index
      %c0_24 = arith.constant 0 : index
      %42 = vector.load %arg5[%c0_23, %c0_24] : memref<1x128xf32, #tpu.memory_space<vmem>>, vector<1x128xf32>
      %43 = vector.broadcast %42 : vector<1x128xf32> to vector<8x128xf32>
      %44 = arith.mulf %43, %29 : vector<8x128xf32>
      %45 = vector.broadcast %41 : vector<8x1xf32> to vector<8x128xf32>
      %46 = arith.mulf %44, %45 : vector<8x128xf32>
      %c0_25 = arith.constant 0 : index
      %c0_26 = arith.constant 0 : index
      %47 = vector.load %arg6[%c0_25, %c0_26] : memref<1x128xf32, #tpu.memory_space<vmem>>, vector<1x128xf32>
      %48 = vector.broadcast %47 : vector<1x128xf32> to vector<8x128xf32>
      %49 = arith.addf %46, %48 : vector<8x128xf32>
      %c0_27 = arith.constant 0 : index
      %c0_28 = arith.constant 0 : index
      %50 = vector.load %arg8[%c0_27, %c0_28] : memref<8x128xf32, #tpu.memory_space<vmem>>, vector<8x128xf32>
      tpu.vector_store %arg8[%c0_27, %c0_28], %49 {strides = array<i32>} : memref<8x128xf32, #tpu.memory_space<vmem>>, vector<8x128xf32>,
    } else {
    }
    return
  }
  func.func @transform_0(%arg0: i32, %arg1: i32) -> (i32, i32) {
    %c0_i32 = arith.constant 0 : i32
    return %arg0, %arg1 : i32, i32
  }
  func.func @transform_1(%arg0: i32, %arg1: i32) -> (i32, i32) {
    %c0_i32 = arith.constant 0 : i32
    %c0_i32_0 = arith.constant 0 : i32
    return %arg1, %c0_i32 : i32, i32
  }
  func.func @transform_2(%arg0: i32, %arg1: i32) -> (i32, i32) {
    %c0_i32 = arith.constant 0 : i32
    %c0_i32_0 = arith.constant 0 : i32
    %c0_i32_1 = arith.constant 0 : i32
    return %c0_i32, %c0_i32_0 : i32, i32
  }
  func.func @transform_3(%arg0: i32, %arg1: i32) -> (i32, i32) {
    %c0_i32 = arith.constant 0 : i32
    %c0_i32_0 = arith.constant 0 : i32
    %c0_i32_1 = arith.constant 0 : i32
    return %c0_i32, %c0_i32_0 : i32, i32
  }
  func.func @transform_4(%arg0: i32, %arg1: i32) -> (i32, i32) {
    %c0_i32 = arith.constant 0 : i32
    %c0_i32_0 = arith.constant 0 : i32
    %c0_i32_1 = arith.constant 0 : i32
    return %c0_i32, %c0_i32_0 : i32, i32
  }
  func.func @transform_5(%arg0: i32, %arg1: i32) -> (i32, i32) {
    %c0_i32 = arith.constant 0 : i32
    %c0_i32_0 = arith.constant 0 : i32
    %c0_i32_1 = arith.constant 0 : i32
    return %c0_i32, %c0_i32_0 : i32, i32
  }
  func.func @transform_6(%arg0: i32, %arg1: i32) -> (i32, i32) {
    %c0_i32 = arith.constant 0 : i32
    %c0_i32_0 = arith.constant 0 : i32
    return %arg0, %c0_i32 : i32, i32
  }
}

</mosaic_0001>

<bundles_post_ra>
// kernel: tpu_custom_call.1
= control target key start
LH: loop header
LB: loop body
LE: loop exit
PB: predicated region body
PF: predicated region fallthrough
CT: control target
= control target key end

     0   :  { %s1056_s0 = inlined_call_operand.hbm [shape: f32[16,128], index: 0, kind: input, shape index: {}]   ;;  %s1057_s1 = inlined_call_operand.hbm [shape: bf16[128,128], index: 1, kind: input, shape index: {}]   ;;  %s1058_s2 = inlined_call_operand.vmem [shape: f32[1,128], index: 2, kind: input, shape index: {}]   ;;  %s1059_s3 = inlined_call_operand.vmem [shape: f32[1,128], index: 3, kind: input, shape index: {}]   ;;  %s1060_s4 = inlined_call_operand.vmem [shape: f32[1,128], index: 4, kind: input, shape index: {}]   ;;  %s1061_s5 = inlined_call_operand.vmem [shape: f32[1,128], index: 5, kind: input, shape index: {}]   ;;  %s1062_s6 = inlined_call_operand.hbm [shape: f32[16,128], index: 6, kind: output, shape index: {}]  }
   0x1   :  { %1063 = sst [smem:[#allocation12_spill]] %s1057_s1 }
   0x2   :  { %11 = vsyncpa [#allocation4], 0 }
   0x3   :  { %13 = vsyncpa [#allocation4 + $0x1], 0 }
   0x4   :  { %14 = vsyncpa [#allocation7], 0 }
   0x5   :  { %15 = vsyncpa [#allocation5], 0 }
   0x6   :  { %17 = vsyncpa [#allocation5 + $0x1], 0  ;;  %s897_s21 = smov 0   ;;  %s899_s22 = smov 0  }
   0x7   :  { %s901_s23 = smov 0   ;;  %s903_s24 = smov 0  }
   0x8   :  { %s905_s25 = smov 0   ;;  %s907_s26 = smov 0  }
   0x9 LB: > { %s573_s27 = sadd.s32 4294967295, %s857_s26   ;;  %p575_p0 = scmp.ge.s32.totalorder %s857_s26, 1  ;;  %s857_s26 = sphi %s907_s26, %s23_s26   ;;  %s853_s25 = sphi %s905_s25, %s1075_s25   ;;  %s849_s24 = sphi %s903_s24, %s1074_s24   ;;  %s845_s23 = sphi %s901_s23, %s1073_s23   ;;  %s841_s22 = sphi %s899_s22, %s1072_s22   ;;  %s837_s21 = sphi %s897_s21, %s1071_s21  }
   0xa   : > { %p929_p1 = scmp.eq.s32.totalorder %s573_s27, 0  ;;  %p204_p2 = scmp.lt.s32.totalorder %s857_s26, 3 }
   0xb   : > { %s1065_s1 = sld [smem:[#allocation12_spill]]  ;;  %s859_s9 = smov [#allocation6]  }
   0xc   : > { %p937_p3 = pnand %p575_p0, %p204_p2  ;;  %s220_s10 = sshll.u32 %s859_s9, 4  ;;  %s221_s10 = int_to_ptr.vmem [resolvable:$true] %s220_s10 }
   0xd   : > { %p577_p6 = scmp.ge.s32.totalorder %s857_s26, 2  ;;  %s860_s11 = smov 64  }
   0xe   : > { %p636_p4 = pneg %p937_p3  ;;  %s861_s12 = smov 4  }
   0xf   : > { %s574_s13 = sadd.s32 4294967294, %s857_s26   ;;  %s35_s14 = sadd.s32 1, %s853_s25 }
  0x10   : > { %p637_p5 = pnand %p636_p4, %p929_p1  ;;  %s44_s15 = sadd.s32 1, %s845_s23 }
  0x11   : > { %s218_s7 = sshll.u32 %s1065_s1, 4  ;;  %p37_p7 = scmp.ge.s32.totalorder %s35_s14, 2  ;;  %s219_s7 = int_to_ptr.hbm [resolvable:$true] %s218_s7 }
  0x12   : > { %639 = dma.hbm_to_vmem [thread:$0]  (!%p637_p5), %s219_s7, 1024, %s221_s10, [#allocation7], %s860_s11, %s860_s11, %s861_s12  }
  0x13   : > { %p51_p8 = scmp.ne.s32.totalorder %s845_s23, %s841_s22  ;;  %p52_p9 = scmp.eq.s32.totalorder %s857_s26, 0 }
  0x14   : > { %p57_p10 = scmp.ne.s32.totalorder %s841_s22, %s837_s21  ;;  %s1077_s14 = smov (%p37_p7, %s35_s14), 0 }
  0x15   : > { %p956_p11 = por %p52_p9, %p51_p8  ;;  %s39_s18 = ssub.s32 %s853_s25, %s1077_s14 }
  0x16   : > { %p962_p12 = por %p929_p1, %p57_p10  ;;  %p191_p13 = scmp.eq.s32.totalorder %s573_s27, 1 }
  0x17   : > { %p42_p0 = scmp.eq.s32.totalorder %s39_s18, 0  ;;  %p197_p2 = scmp.eq.s32.totalorder %s574_s13, 1 }
  0x18   : > { %p968_p4 = por %p191_p13, %p51_p8  ;;  %p649_p5 = scmp.lt.s32.totalorder %s857_s26, 2 }
  0x19   : > { %s974_s20 = scalar_select %p42_p0, %s845_s23, %s44_s15  }
  0x1a   : > { %p976_p7 = por %p197_p2, %p57_p10  ;;  %s246_s30 = sand.u32 1, %s845_s23  }
  0x1b   : > { %s578_s7 = sshll.u32 %s246_s30, 3  ;;  %s579_s9 = sshll.u32 %s853_s25, 3 }
  0x1c   : > { %s255_s27 = scalar_lea.hbm %s1056_s0, %s579_s9  ;;  %s250_s12 = scalar_lea.vmem [#allocation3], %s578_s7 }
  0x1d   : > { %s259_s13 = sshll.u32 %s250_s12, 4  ;;  %s257_s18 = sshll.u32 %s255_s27, 4  ;;  %s260_s13 = int_to_ptr.vmem [resolvable:$true] %s259_s13  ;;  %s258_s18 = int_to_ptr.hbm [resolvable:$true] %s257_s18 }
  0x1e   : > { %p641_p8 = pnand %p649_p5, %p956_p11  ;;  %s247_s15 = scalar_lea.sflag [#allocation4], %s246_s30 }
  0x1f   : > { %268 = sbr.rel (%p937_p3) target bundleno = 490 (0x1ea), region = 44  ;;  %s990_s1 = sand.u32 (!%p937_p3), 1, %s841_s22  }
  0x20   : > { %643 = dma.hbm_to_vmem [thread:$0]  (!%p641_p8), %s258_s18, 128, %s260_s13, %s247_s15  }
  0x21   : > { %s581_s9 = sshll.u32 (!%p937_p3), %s990_s1, 3  ;;  %s271_s7 = scalar_lea.sflag (!%p937_p3), [#allocation4], %s990_s1 }
  0x22   : > { %s274_s10 = scalar_lea.vmem (!%p937_p3), [#allocation3], %s581_s9 }
  0x24   : > { %824 = dma.done.wait (%p962_p12), %s271_s7, 128  }
  0x25   : > { %826 = vsyncadd (%p962_p12), %s271_s7, 4294967168 }
  0x26   : > { %828 = dma.done.wait (%p929_p1), [#allocation7], 1024  }
  0x27   : > { %830 = vsyncadd (%p929_p1), [#allocation7], 4294966272  ;;  %v627_v0 = vld [vmem:[#allocation6 + $0x38] sm:$0xff]  ;;  %v626_v1 = vld [vmem:[#allocation6 + $0x30] sm:$0xff]  ;;  %s617_s30 = sshll.u32 %s849_s24, 3  ;;  %s308_s7 = scalar_lea.vmem [#allocation8], %s581_s9 }
  0x28   : > { %382 = vmatpush.bf16.msra.mxu0 %v627_v0  ;;  %v625_v2 = vld [vmem:[#allocation6 + $0x28] sm:$0xff]  ;;  %v624_v3 = vld [vmem:[#allocation6 + $0x20] sm:$0xff]  ;;  %v623_v4 = vld [vmem:[#allocation6 + $0x18] sm:$0xff]  ;;  %s476_s18 = scalar_lea.hbm %s1062_s6, %s617_s30  ;;  %s466_s8 = scalar_lea.sflag [#allocation5], %s990_s1 }
  0x29   : > { %v622_v5 = vld [vmem:[#allocation6 + $0x10] sm:$0xff]  ;;  %v621_v6 = vld [vmem:[#allocation6 + $0x8] sm:$0xff]  ;;  %v620_v7 = vld [vmem:[#allocation6] sm:$0xff]  ;;  %s480_s28 = sshll.u32 %s476_s18, 4  ;;  %s791_s27 = scalar_lea.hbm %s1062_s6, 16  ;;  %s481_s28 = int_to_ptr.hbm [resolvable:$true] %s480_s28 }
  0x2a   : > { %v315_v8 = vld [vmem:[%s274_s10] sm:$0xff]  ;;  %s478_s10 = sshll.u32 %s308_s7, 4  ;;  %s785_s16 = sshra.s32 %s481_s28, 4  ;;  %s479_s10 = int_to_ptr.vmem [resolvable:$true] %s478_s10  ;;  %s786_s16 = int_to_ptr.hbm [resolvable:$true] %s785_s16 }
  0x2b   : > { %v317_v9 = vpack.c.bf16 %v315_v8, %v315_v8  ;;  %v703_v10 = vld [vmem:[%s1058_s2] ss:$0 sm:$0xff]  ;;  %s787_s17 = scalar_lea.hbm %s786_s16, 8  ;;  %p792_p10 = scmp.lt.s32.totalorder %s786_s16, %s1062_s6 }
  0x2c   : > { %383 = vmatpush.bf16.msra.mxu0 %v626_v1  ;;  %v705_v17 = vld [vmem:[%s1061_s5] ss:$0 sm:$0xff]  ;;  %p788_p1 = scmp.ne.s32.totalorder %s786_s16, %s787_s17  ;;  %p793_p11 = scmp.lt.s32.totalorder %s791_s27, %s787_s17 }
  0x2d   : > { %v704_v38 = vld [vmem:[%s1059_s3] ss:$0 sm:$0xff] }
  0x2e   : > { %v706_v45 = vld [vmem:[%s1060_s4] ss:$0 sm:$0xff]  ;;  %p789_p3 = pnand %p788_p1, %p968_p4  ;;  %p794_p12 = por %p793_p11, %p792_p10 }
  0x30   : > { %384 = vmatpush.bf16.msra.mxu0 %v625_v2  ;;  %p790_p9 = pneg %p789_p3 }
  0x32   : > { %p795_p13 = pnand %p794_p12, %p790_p9 }
  0x34   : > { %385 = vmatpush.bf16.msra.mxu0 %v624_v3 }
  0x38   : > { %386 = vmatpush.bf16.msra.mxu0 %v623_v4 }
  0x3c   : > { %387 = vmatpush.bf16.msra.mxu0 %v622_v5 }
  0x40   : > { %388 = vmatpush.bf16.msra.mxu0 %v621_v6 }
  0x44   : > { %389 = vmatpush.bf16.msra.mxu0 %v620_v7 }
  0x47   : > { %390 = vmatmul.bf16.vlgmr.msra.gmra.mxu0 %v317_v9 }
  0xc4   : > { %v391_v11 = vpop.f32.mrf.mxu0 }
  0xc5   : > { %v402_v12 = vadd.f32 %v391_v11, %v315_v8 }
  0xc7   : > { %v412_v13 = vadd.f32 %v703_v10, %v402_v12 }
  0xc9   : > { %413 = vadd.xlane.f32.xlu0 %v412_v13 }
  0xcc   : > { %v393_v14 = vpop.f32.mrf.mxu0 }
 0x13c   : > { %v414_v15 = vpop.xlane.xlu0 %413 }
 0x13d   : > { %v415_v16 = vmul.f32 0.03125, %v414_v15 }
 0x13f   : > { %v416_v18 = vsub.f32 %v412_v13, %v415_v16 }
 0x141   : > { %v421_v19 = vmul.f32 %v705_v17, %v416_v18  ;;  %v457_v43 = vmul.f32 %v704_v38, %v416_v18 }
 0x143   : > { %v422_v20 = vmul.f32 %v421_v19, %v421_v19 }
 0x145   : > { %423 = vadd.xlane.f32.xlu0 %v422_v20 }
 0x1b8   : > { %v424_v21 = vpop.xlane.xlu0 %423 }
 0x1b9   : > { %v425_v22 = vmul.f32 0.032258064, %v424_v21 }
 0x1bb   : > { %707 = vrsqrt.f32 %v425_v22  ;;  %vm433_vm0 = vcmp.eq.f32.partialorder %v425_v22, inf  ;;  %v436_v30 = vand.u32 2147483648, %v425_v22  ;;  %vm435_vm1 = vcmp.eq.f32.partialorder %v425_v22, 0.0 }
 0x1c1   : > { %v708_v23 = vpop.eup %707 }
 0x1c2   : > { %v427_v24 = vmul.f32 %v708_v23, %v425_v22 }
 0x1c4   : > { %v428_v25 = vmul.f32 %v708_v23, %v427_v24 }
 0x1c6   : > { %v429_v26 = vmul.f32 0.5, %v428_v25 }
 0x1c8   : > { %v430_v27 = vsub.f32 1.5, %v429_v26 }
 0x1ca   : > { %v431_v28 = vmul.f32 %v708_v23, %v430_v27 }
 0x1cc   : > { %v432_v29 = vmul.f32 %v431_v28, %v425_v22 }
 0x1ce   : > { %v434_v31 = vsel %vm433_vm0, %v425_v22, %v432_v29 }
 0x1cf   : > { %v437_v32 = vsel %vm435_vm1, %v436_v30, %v434_v31 }
 0x1d0   : > { %v438_v33 = vadd.f32 1e-06, %v437_v32 }
 0x1d2   : > { %709 = vrcp.f32 %v438_v33  ;;  %v450_v37 = vand.u32 2147483648, %v438_v33  ;;  %v448_v40 = vand.u32 2147483647, %v438_v33  ;;  %vm444_vm3 = vweird.f32 %v438_v33 }
 0x1d4   : > { %v451_v42 = vor.u32 1.1754944e-38, %v450_v37  ;;  %vm449_vm5 = vcmp.eq.f32.partialorder %v448_v40, 8.507059e+37 }
 0x1d8   : > { %v710_v34 = vpop.eup %709 }
 0x1d9   : > { %v440_v35 = vmul.f32 %v710_v34, %v438_v33  ;;  %vm445_vm2 = vweird.f32 %v710_v34 }
 0x1da   : > { %vm446_vm4 = vmor %vm444_vm3, %vm445_vm2 }
 0x1db   : > { %v441_v36 = vsub.f32 1.0, %v440_v35 }
 0x1dd   : > { %v442_v39 = vmul.f32 %v710_v34, %v441_v36 }
 0x1df   : > { %v443_v41 = vadd.f32 %v710_v34, %v442_v39 }
 0x1e1   : > { %v447_v44 = vsel %vm446_vm4, %v710_v34, %v443_v41 }
 0x1e2   : > { %v452_v46 = vsel %vm449_vm5, %v451_v42, %v447_v44 }
 0x1e3   : > { %v458_v47 = vmul.f32 %v457_v43, %v452_v46 }
 0x1e5   : > { %v463_v48 = vadd.f32 %v706_v45, %v458_v47 }
 0x1e7   : > { %464 = vst [vmem:[%s308_s7] sm:$0xff] %v463_v48 }
 0x1e8   : > { %798 = shalt.err (!%p795_p13)
}
 0x1e9   : > { %634 = dma.vmem_to_hbm [thread:$0]  (%p968_p4), %s479_s10, 128, %s481_s28, %s466_s8  }
 0x1ea PF: > { %s492_s1 = sand.u32 1, %s837_s21   ;;  %p645_p0 = pnand %p577_p6, %p976_p7 }
 0x1eb   : > { %s493_s13 = scalar_lea.sflag [#allocation5], %s492_s1 }
 0x1ec   : > { %p646_p2 = pneg %p645_p0 }
 0x1ee   : > { %832 = dma.done.wait (%p646_p2), %s493_s13, 128  }
 0x1ef   : > { %834 = vsyncadd (%p646_p2), %s493_s13, 4294967168  ;;  %s23_s26 = sadd.s32 1, %s857_s26   ;;  %s1071_s21 = smov %s841_s22 }
 0x1f0   : > { %p20_p5 = scmp.ge.s32.totalorder %s23_s26, 4   ;;  %s1072_s22 = smov %s845_s23 }
 0x1f1   : > { %s1073_s23 = smov %s974_s20  ;;  %s1074_s24 = smov %s853_s25 }
 0x1f2   : > { %s1075_s25 = smov %s1077_s14  ;;  %22 = sbr.rel (!%p20_p5) target bundleno = 9 (0x9), region = 103 }
 0x1f7   :  { %499 = vsyncpa [#allocation4], 1 }
 0x1f8   :  { %501 = vsyncpa [#allocation4 + $0x1], 1 }
 0x1f9   :  { %502 = vsyncpa [#allocation7], 1 }
 0x1fa   :  { %503 = vsyncpa [#allocation5], 1 }
 0x1fb   :  { %505 = vsyncpa [#allocation5 + $0x1], 1 }

</bundles_post_ra>
